<compile_context>
chip_gen: v6e
topology: v6e:2x2x1
jax: 0.10.0
libtpu: 0.0.40
codegen_flags: <defaults>
</compile_context>

<pallas_src>
import jax
import jax.numpy as jnp
from jax import lax
from jax.experimental import pallas as pl
from jax.experimental.pallas import tpu as pltpu


# ----------------------------------------------------------------------------
# Path 1: VMEM-resident table, gather via one-hot matmul on the MXU.
# ----------------------------------------------------------------------------
def _direct_encoder_resident_kernel(ids_ref,    # VMEM [1, TN] int32 (per-block ids)
                                    table_ref,  # VMEM [V_pad, D] (resident, constant idx map)
                                    out_ref):   # VMEM [D, TN]
    v_pad = table_ref.shape[0]
    tn = ids_ref.shape[1]

    ids = ids_ref[...]                                            # [1, TN] int32
    rows = lax.broadcasted_iota(jnp.int32, (v_pad, tn), 0)        # row id per position
    one_hot_t = (rows == ids).astype(table_ref.dtype)             # [V_pad, TN]

    # emb_t[d, j] = sum_v table[v, d] * one_hot_t[v, j]
    # Contracting dim 0 of both operands ("TN" matmul) -> output is already the
    # transposed [D, TN] tile, so no XLU transpose is needed afterwards.
    emb_t = lax.dot_general(
        table_ref[...], one_hot_t,
        dimension_numbers=(((0,), (0,)), ((), ())),
        preferred_element_type=jnp.float32)                       # [D, TN] f32 (MXU)

    ssq = jnp.sum(emb_t * emb_t, axis=0, keepdims=True)           # [1, TN] (XLU, only reduce left)
    inv = lax.rsqrt(ssq)                                          # EUP (effectively free)
    out_ref[...] = (emb_t * inv).astype(out_ref.dtype)


# ----------------------------------------------------------------------------
# Path 2: table stays in HBM; manual row-gather DMAs, double-buffered across
# grid steps, aggregate wait, chunked compute.
# ----------------------------------------------------------------------------
def _direct_encoder_hbm_kernel(ids_ref,      # SMEM [padded] int32 (scalar prefetch)
                               table_ref,    # HBM  [num_emb, D]   (pl.ANY)
                               out_ref,      # VMEM [D, TN]
                               gather_ref,   # VMEM [2, TN, D] double-buffered gather scratch
                               dma_sem):     # DMA sems, one per slot: (2,)
    tn = gather_ref.shape[1]
    d = gather_ref.shape[2]
    b = pl.program_id(0)
    nb = pl.num_programs(0)

    def issue_block(block_idx, slot):
        base = block_idx * tn

        def body(i, carry):
            row = ids_ref[base + i]
            pltpu.make_async_copy(
                table_ref.at[pl.ds(row, 1), :],
                gather_ref.at[slot, pl.ds(i, 1), :],
                dma_sem.at[slot],
            ).start()
            return carry

        # Unrolled issue loop: lets the scalar id load, descriptor build and
        # DMA start co-issue across iterations (review item).
        lax.fori_loop(0, tn, body, 0, unroll=8)

    # Prologue: first grid step issues its own block into slot 0.
    @pl.when(b == 0)
    def _():
        issue_block(0, 0)

    slot = lax.rem(b, 2)

    # Single aggregate wait: DMA semaphores count bytes, so one descriptor
    # covering the whole [TN, D] slot consumes the completions of all TN
    # equal-sized row copies that were issued into it (review item).
    pltpu.make_async_copy(gather_ref.at[slot], gather_ref.at[slot],
                          dma_sem.at[slot]).wait()

    # Cross-step prefetch: start the next block's row gathers into the other
    # slot before doing this block's compute (review item).  This cross-step
    # state is why the grid axis is marked "arbitrary", not "parallel".
    @pl.when(b + 1 < nb)
    def _():
        issue_block(b + 1, 1 - slot)

    # Compute in 128-row sub-chunks to bound live f32 temporaries (review
    # item).  Sum-of-squares goes to the (otherwise idle) MXU so the XLU only
    # has to do the transpose; cast to the output dtype BEFORE transposing.
    chunk = min(tn, 128)
    ones_col = jnp.ones((d, 1), dtype=jnp.float32)
    for c in range(tn // chunk):
        off = c * chunk
        x = gather_ref[slot, pl.ds(off, chunk), :].astype(jnp.float32)   # [chunk, D]
        ssq = jnp.dot(x * x, ones_col, preferred_element_type=jnp.float32)  # [chunk, 1] (MXU)
        inv = lax.rsqrt(ssq)                                             # EUP
        y = (x * inv).astype(out_ref.dtype)                              # cast first
        out_ref[:, pl.ds(off, chunk)] = y.T                              # [D, chunk]


# ----------------------------------------------------------------------------
# Wrapper
# ----------------------------------------------------------------------------
def _round_up(x, m):
    return ((x + m - 1) // m) * m


def _pick_block_nodes(n, block_nodes):
    # Lane-dense blocks (multiple of 128); aim for >=2 grid steps so the grid
    # axis can be sharded across v7x's two TensorCores (review item).
    target_blocks = max(2, pl.cdiv(n, max(1, block_nodes)))
    tn = _round_up(pl.cdiv(n, target_blocks), 128)
    return max(128, min(tn, _round_up(block_nodes, 128)))


def _vmem_limit(need_bytes):
    # Explicit scoped-VMEM budget with headroom, capped below v7x's 64 MiB.
    return int(min(max(2 * need_bytes, 16 * 1024 * 1024), 48 * 1024 * 1024))


def direct_encoder_forward(table, nodes, *, block_nodes=1024,
                           resident_budget_bytes=8 * 1024 * 1024,
                           force_hbm_gather=False, trim=True):
    """Pallas equivalent of DirectEncoder.forward(nodes, mode, offset=None).

    table : [num_embeddings, embed_dim]  (the nn.EmbeddingBag weight)
    nodes : [num_nodes] int32 node ids
    returns [embed_dim, num_nodes] with each column L2-normalized
            (or [embed_dim, padded] if trim=False, to skip the tail slice).
    """
    num_emb, embed_dim = table.shape
    n = int(nodes.shape[0])

    tn = _pick_block_nodes(n, int(block_nodes))
    padded = _round_up(n, tn)
    grid = padded // tn
    ids = jnp.pad(nodes.astype(jnp.int32), (0, padded - n))   # pad id 0; padded cols trimmed

    itemsize = jnp.dtype(table.dtype).itemsize
    out_bytes_tile = embed_dim * tn * itemsize

    # Sublane-align the table row count for the resident (matmul-gather) path.
    sublane = 8 * max(1, 4 // itemsize)
    v_pad = _round_up(num_emb, sublane)
    table_bytes = v_pad * embed_dim * itemsize
    onehot_bytes = v_pad * tn * itemsize
    use_resident = (not force_hbm_gather) and (
        table_bytes + onehot_bytes <= resident_budget_bytes)

    if use_resident:
        # --- resident-table path -------------------------------------------
        table_p = table if v_pad == num_emb else jnp.pad(
            table, ((0, v_pad - num_emb), (0, 0)))
        ids2d = ids.reshape(1, padded)

        need = (table_bytes + onehot_bytes + 2 * out_bytes_tile
                + 2 * tn * 4 + embed_dim * tn * 4)
        cost = pl.CostEstimate(
            flops=2 * v_pad * embed_dim * padded + 3 * embed_dim * padded,
            transcendentals=padded,
            bytes_accessed=table_bytes + padded * 4 + embed_dim * padded * itemsize)

        out = pl.pallas_call(
            _direct_encoder_resident_kernel,
            out_shape=jax.ShapeDtypeStruct((embed_dim, padded), table.dtype),
            grid=(grid,),
            in_specs=[
                pl.BlockSpec((1, tn), lambda b: (0, b)),               # node ids per block
                pl.BlockSpec((v_pad, embed_dim), lambda b: (0, 0)),    # resident table
            ],
            out_specs=pl.BlockSpec((embed_dim, tn), lambda b: (0, b)),
            compiler_params=pltpu.CompilerParams(
                dimension_semantics=("parallel",),                     # independent blocks
                vmem_limit_bytes=_vmem_limit(need)),
            cost_estimate=cost,
        )(ids2d, table_p)
    else:
        # --- HBM manual-gather path -----------------------------------------
        need = 2 * tn * embed_dim * itemsize + 2 * out_bytes_tile + 3 * 128 * embed_dim * 4
        cost = pl.CostEstimate(
            flops=4 * padded * embed_dim,
            transcendentals=padded,
            bytes_accessed=padded * embed_dim * itemsize
            + embed_dim * padded * itemsize + padded * 4)

        out = pl.pallas_call(
            _direct_encoder_hbm_kernel,
            out_shape=jax.ShapeDtypeStruct((embed_dim, padded), table.dtype),
            grid_spec=pltpu.PrefetchScalarGridSpec(
                num_scalar_prefetch=1,                       # node ids -> SMEM
                grid=(grid,),
                in_specs=[pl.BlockSpec(memory_space=pl.ANY)],  # table stays in HBM
                out_specs=pl.BlockSpec((embed_dim, tn), lambda b, ids: (0, b)),
                scratch_shapes=[
                    pltpu.VMEM((2, tn, embed_dim), table.dtype),   # double-buffered gather
                    pltpu.SemaphoreType.DMA((2,)),                 # one sem per slot
                ],
            ),
            compiler_params=pltpu.CompilerParams(
                dimension_semantics=("arbitrary",),          # cross-step prefetch state
                vmem_limit_bytes=_vmem_limit(need)),
            cost_estimate=cost,
        )(ids, table)

    if trim and padded != n:
        # NOTE(review): consumers that can handle the padded tail should pass
        # trim=False to skip this extra HBM round-trip.
        return out[:, :n]
    return out


# ----------------------------------------------------------------------------
# Demo / correctness check
# ----------------------------------------------------------------------------
if __name__ == "__main__":
    key = jax.random.PRNGKey(0)
    k_tab, k_ids, k_tab2, k_ids2 = jax.random.split(key, 4)

    embed_dim, num_nodes = 128, 300

    def reference(table, nodes):
        emb = table[nodes]                                            # [n, D]
        return (emb / jnp.linalg.norm(emb, axis=1, keepdims=True)).T  # [D, n]

    # Path 1: small table -> VMEM-resident one-hot-matmul gather.
    num_embeddings = 50
    table = jax.random.normal(k_tab, (num_embeddings, embed_dim), dtype=jnp.float32)
    nodes = jax.random.randint(k_ids, (num_nodes,), 0, num_embeddings, dtype=jnp.int32)
    out = jax.block_until_ready(direct_encoder_forward(table, nodes, block_nodes=256))
    ref = reference(table, nodes)
    if out.shape != ref.shape or not bool(jnp.allclose(out, ref, rtol=1e-3, atol=1e-3)):
        raise AssertionError("Pallas DirectEncoder (resident path) output mismatch")

    # Path 2: force the HBM manual-gather path (used for large tables).
    num_embeddings2 = 512
    table2 = jax.random.normal(k_tab2, (num_embeddings2, embed_dim), dtype=jnp.float32)
    nodes2 = jax.random.randint(k_ids2, (num_nodes,), 0, num_embeddings2, dtype=jnp.int32)
    out2 = jax.block_until_ready(
        direct_encoder_forward(table2, nodes2, block_nodes=256, force_hbm_gather=True))
    ref2 = reference(table2, nodes2)
    if out2.shape != ref2.shape or not bool(jnp.allclose(out2, ref2, rtol=1e-3, atol=1e-3)):
        raise AssertionError("Pallas DirectEncoder (HBM gather path) output mismatch")

    print("KERNEL_OK")
</pallas_src>

<mosaic_0001>
module attributes {stable_mosaic.version = 11 : i64} {
  func.func @_direct_encoder_resident_kernel(%arg0: i32, %arg1: memref<1x256xi32, #tpu.memory_space<vmem>>, %arg2: memref<56x128xf32, #tpu.memory_space<vmem>>, %arg3: memref<128x256xf32, #tpu.memory_space<vmem>>) attributes {dimension_semantics = [#tpu.dimension_semantics<parallel>], iteration_bounds = array<i64: 2>, scalar_prefetch = 0 : i64, scratch_operands = 0 : i64, tpu.core_type = #tpu.core_type<tc>, window_params = [{transform_indices = @transform_0, window_bounds = array<i64: 1, 256>}, {pipeline_mode = #tpu.pipeline_mode<synchronous>, transform_indices = @transform_1, window_bounds = array<i64: 56, 128>}, {transform_indices = @transform_2, window_bounds = array<i64: 128, 256>}]} {
    %c0 = arith.constant 0 : index
    %c0_0 = arith.constant 0 : index
    %0 = vector.load %arg1[%c0, %c0_0] : memref<1x256xi32, #tpu.memory_space<vmem>>, vector<1x256xi32>
    %1 = tpu.iota {dimensions = array<i32: 0>} : vector<56x256xi32>
    %2 = vector.broadcast %0 : vector<1x256xi32> to vector<56x256xi32>
    %3 = arith.cmpi eq, %1, %2 : vector<56x256xi32>
    %4 = arith.extui %3 : vector<56x256xi1> to vector<56x256xi32>
    %5 = arith.sitofp %4 : vector<56x256xi32> to vector<56x256xf32>
    %c0_1 = arith.constant 0 : index
    %c0_2 = arith.constant 0 : index
    %6 = vector.load %arg2[%c0_1, %c0_2] : memref<56x128xf32, #tpu.memory_space<vmem>>, vector<56x128xf32>
    %cst = arith.constant dense<0.000000e+00> : vector<128x256xf32>
    %7 = tpu.matmul %6, %5, %cst {dimension_numbers = #tpu.dot_dimension_numbers<[0], [0], [1], [1], [0, 1, 1, 1], [], []>} : vector<56x128xf32>, vector<56x256xf32>, vector<128x256xf32> -> vector<128x256xf32>
    %8 = arith.mulf %7, %7 : vector<128x256xf32>
    %cst_3 = arith.constant dense<0.000000e+00> : vector<256xf32>
    %9 = vector.multi_reduction <add>, %8, %cst_3 [0] : vector<128x256xf32> to vector<256xf32>
    %10 = vector.shape_cast %9 : vector<256xf32> to vector<1x256xf32>
    %11 = math.rsqrt %10 : vector<1x256xf32>
    %12 = vector.broadcast %11 : vector<1x256xf32> to vector<128x256xf32>
    %13 = arith.mulf %7, %12 : vector<128x256xf32>
    %c0_4 = arith.constant 0 : index
    %c0_5 = arith.constant 0 : index
    %14 = vector.load %arg3[%c0_4, %c0_5] : memref<128x256xf32, #tpu.memory_space<vmem>>, vector<128x256xf32>
    tpu.vector_store %arg3[%c0_4, %c0_5], %13 {strides = array<i32>} : memref<128x256xf32, #tpu.memory_space<vmem>>, vector<128x256xf32>,
    return
  }
  func.func @transform_0(%arg0: i32) -> (i32, i32) {
    %c0_i32 = arith.constant 0 : i32
    %c0_i32_0 = arith.constant 0 : i32
    return %c0_i32, %arg0 : i32, i32
  }
  func.func @transform_1(%arg0: i32) -> (i32, i32) {
    %c0_i32 = arith.constant 0 : i32
    %c0_i32_0 = arith.constant 0 : i32
    %c0_i32_1 = arith.constant 0 : i32
    return %c0_i32, %c0_i32_0 : i32, i32
  }
  func.func @transform_2(%arg0: i32) -> (i32, i32) {
    %c0_i32 = arith.constant 0 : i32
    %c0_i32_0 = arith.constant 0 : i32
    return %c0_i32, %arg0 : i32, i32
  }
}

</mosaic_0001>

<bundles_post_ra>
// kernel: tpu_custom_call.1
= control target key start
LH: loop header
LB: loop body
LE: loop exit
PB: predicated region body
PF: predicated region fallthrough
CT: control target
= control target key end

     0   :  { %7 = vsyncpa [#allocation3], 0  ;;  %s1439_s0 = inlined_call_operand.hbm [shape: s32[1,512], index: 0, kind: input, shape index: {}]   ;;  %s1440_s1 = inlined_call_operand.hbm [shape: f32[56,128], index: 1, kind: input, shape index: {}]   ;;  %s1441_s2 = inlined_call_operand.hbm [shape: f32[128,512], index: 2, kind: output, shape index: {}]  }
   0x1   :  { %9 = vsyncpa [#allocation3 + $0x1], 0 }
   0x2   :  { %10 = vsyncpa [#allocation6], 0 }
   0x3   :  { %11 = vsyncpa [#allocation4], 0 }
   0x4   :  { %13 = vsyncpa [#allocation4 + $0x1], 0  ;;  %s1015_s9 = smov 0   ;;  %s1017_s10 = smov 0  }
   0x5   :  { %s1019_s11 = smov 0   ;;  %s1021_s12 = smov 0  }
   0x6 LB: > { %s1036_s13 = sadd.s32 4294967295, %s988_s12   ;;  %s722_s14 = sadd.s32 4294967294, %s988_s12   ;;  %s988_s12 = sphi %s1021_s12, %s1463_s12   ;;  %s984_s11 = sphi %s1019_s11, %s1462_s11   ;;  %s980_s10 = sphi %s1017_s10, %s1461_s10   ;;  %s976_s9 = sphi %s1015_s9, %s1460_s9  }
   0x7   : > { %p39_p0 = scmp.ne.s32.totalorder %s980_s10, %s976_s9  ;;  %p1442_p1 = scmp.eq.s32.totalorder %s1036_s13, 0 }
   0x8   : > { %p90_p3 = scmp.eq.s32.totalorder %s722_s14, 1  ;;  %p723_p5 = scmp.ge.s32.totalorder %s988_s12, 1 }
   0x9   : > { %p1045_p4 = por %p1442_p1, %p39_p0  ;;  %p97_p7 = scmp.lt.s32.totalorder %s988_s12, 3 }
   0xa   : > { %p1050_p6 = por %p90_p3, %p39_p0  ;;  %s990_s18 = smov [#allocation5]  }
   0xb   : > { %s1446_s15 = scalar_select %p1045_p4, 1, 0 }
   0xc   : > { %s1447_s16 = scalar_select %p1050_p6, 1, 0 }
   0xd   : > { %p1055_p8 = pnand %p723_p5, %p97_p7  ;;  %s109_s19 = sshll.u32 %s990_s18, 4  ;;  %s110_s19 = int_to_ptr.vmem [resolvable:$true] %s109_s19 }
   0xe   : > { %s1069_s21 = sadd.s32 1, %s988_s12   ;;  %s26_s22 = sadd.s32 1, %s984_s11 }
   0xf   : > { %s1448_s17 = scalar_select %p1055_p8, 1, 0 }
  0x10   : > { %p806_p9 = pneg %p1055_p8  ;;  %s23_s23 = ssub.s32 %s988_s12, %s1069_s21 }
  0x11   : > { %s877_s24 = scalar_lea.vmem %s110_s19, 896  ;;  %p885_p5 = scmp.lt.s32.totalorder %s110_s19, %s110_s19 }
  0x12   : > { %p1064_p11 = pnand %p806_p9, %p1442_p1  ;;  %p878_p13 = scmp.ne.s32.totalorder %s110_s19, %s877_s24 }
  0x13   : > { %p886_p7 = scmp.lt.s32.totalorder %s877_s24, %s877_s24 }
  0x14   : > { %p868_p12 = pneg %p1064_p11 }
  0x15   : > { %p887_p10 = por %p886_p7, %p885_p5 }
  0x16   : > { %p880_p0 = pnand %p878_p13, %p868_p12 }
  0x18   : > { %p881_p3 = pneg %p880_p0 }
  0x1a   : > { %p888_p2 = pnand %p887_p10, %p881_p3 }
  0x1c   : > { %891 = shalt.err (!%p888_p2)
}
  0x1d   : > { %s991_s25 = smov 128   ;;  %s992_s26 = smov 8  }
  0x1e   : > { %809 = dma.hbm_to_vmem [thread:$0]  (!%p1064_p11), %s1440_s1, 896, %s110_s19, [#allocation6], %s991_s25, %s991_s25, %s992_s26  }
  0x1f   : > { %p24_p9 = scmp.eq.s32.totalorder %s23_s23, 0  ;;  %p33_p12 = scmp.ne.s32.totalorder %s984_s11, %s980_s10 }
  0x20   : > { %p34_p10 = scmp.eq.s32.totalorder %s988_s12, 0  ;;  %p819_p2 = scmp.lt.s32.totalorder %s988_s12, 2 }
  0x21   : > { %s1086_s29 = scalar_select %p24_p9, %s984_s11, %s26_s22  }
  0x22   : > { %p35_p13 = por %p34_p10, %p33_p12  ;;  %p1450_p0 = scmp.eq.s32.totalorder %s1036_s13, 1 }
  0x23   : > { %s123_s3 = sand.u32 1, %s984_s11   ;;  %s782_s4 = sshll.u32 %s988_s12, 5 }
  0x24   : > { %p1090_p3 = por %p1450_p0, %p33_p12  ;;  %s726_s5 = sshll.u32 %s123_s3, 1 }
  0x25   : > { %s1099_s8 = scalar_lea.hbm %s1439_s0, %s782_s4  ;;  %s127_s14 = scalar_lea.vmem [#allocation2], %s726_s5 }
  0x26   : > { %s1451_s30 = scalar_select %p1090_p3, 1, 0 }
  0x27   : > { %s135_s18 = sshll.u32 %s127_s14, 4  ;;  %p1101_p11 = pnand %p819_p2, %p35_p13  ;;  %s136_s18 = int_to_ptr.vmem [resolvable:$true] %s135_s18 }
  0x28   : > { %s124_s20 = scalar_lea.sflag [#allocation3], %s123_s3  ;;  %s892_s22 = scalar_lea.hbm %s1099_s8, 32 }
  0x29   : > { %p893_p5 = scmp.ne.s32.totalorder %s1099_s8, %s892_s22  ;;  %p894_p7 = pneg %p1101_p11 }
  0x2a   : > { %s897_s25 = scalar_lea.hbm %s1439_s0, 64  ;;  %p898_p10 = scmp.lt.s32.totalorder %s1099_s8, %s1439_s0 }
  0x2b   : > { %p895_p9 = pnand %p894_p7, %p893_p5  ;;  %p899_p2 = scmp.lt.s32.totalorder %s897_s25, %s892_s22 }
  0x2d   : > { %p896_p12 = pneg %p895_p9  ;;  %p900_p13 = por %p899_p2, %p898_p10 }
  0x2f   : > { %p901_p0 = pnand %p900_p13, %p896_p12 }
  0x31   : > { %904 = shalt.err (!%p901_p0)
}
  0x32   : > { %s905_s28 = scalar_lea.vmem %s136_s18, 32  ;;  %s993_s3 = smov [#allocation2]  }
  0x33   : > { %p906_p1 = scmp.ne.s32.totalorder %s136_s18, %s905_s28  ;;  %s910_s4 = sshll.u32 %s993_s3, 4  ;;  %s911_s4 = int_to_ptr.vmem [resolvable:$false] %s910_s4 }
  0x34   : > { %s912_s5 = scalar_lea.vmem %s911_s4, 64  ;;  %p913_p5 = scmp.lt.s32.totalorder %s136_s18, %s911_s4 }
  0x35   : > { %p908_p6 = pnand %p906_p1, %p894_p7  ;;  %p914_p9 = scmp.lt.s32.totalorder %s912_s5, %s905_s28 }
  0x37   : > { %p909_p3 = pneg %p908_p6  ;;  %p915_p4 = por %p914_p9, %p913_p5 }
  0x39   : > { %p916_p8 = pnand %p915_p4, %p909_p3 }
  0x3b   : > { %919 = shalt.err (!%p916_p8)
}
  0x3c   : > { %813 = dma.hbm_to_vmem [thread:$0]  (!%p1101_p11), %s1099_s8, 32, %s136_s18, %s124_s20  }
  0x3d   : > { %p1453_p12 = scmp.ne.s32.totalorder %s1448_s17, 0 }
  0x3e   : > { %s1122_s6 = sand.u32 (!%p1453_p12), 1, %s980_s10   ;;  %p1454_p1 = scmp.ne.s32.totalorder (!%p1453_p12), %s1446_s15, 0 }
  0x3f   : > { %144 = sbr.rel (%p1453_p12) target bundleno = 515 (0x203), region = 28  ;;  %s730_s7 = sshll.u32 (!%p1453_p12), %s1122_s6, 1 }
  0x40   : > { %s147_s14 = scalar_lea.sflag (!%p1453_p12), [#allocation3], %s1122_s6  ;;  %s150_s22 = scalar_lea.vmem (!%p1453_p12), [#allocation2], %s730_s7 }
  0x44   : > { %963 = dma.done.wait (%p1454_p1), %s147_s14, 32  }
  0x45   : > { %965 = vsyncadd (%p1454_p1), %s147_s14, 4294967264  ;;  %p1455_p4 = scmp.eq.s32.totalorder %s1036_s13, 0 }
  0x47   : > { %967 = dma.done.wait (%p1455_p4), [#allocation6], 896   ;;  %p1456_p6 = pmov %p1455_p4 }
  0x48   : > { %v178_v0 = vlaneseq  ;;  %v994_v1 = vmov 0.0   ;;  %v236_v5 = vld [vmem:[#allocation5] sm:$0xff]  ;;  %v237_v8 = vld [vmem:[#allocation5 + $0x8] sm:$0xff]  ;;  %v177_v9 = vld [vmem:[%s150_s22] sm:$0x3]  ;;  %v995_v15 = vmov 1.0  }
  0x49   : > { %969 = vsyncadd (%p1456_p6), [#allocation6], 4294966400  ;;  %388 = vmatprep.mubr.f32.mxu0 %v994_v1  ;;  %436 = vmatprep.mubr.f32.mxu1 %v994_v1  ;;  %v238_v14 = vld [vmem:[#allocation5 + $0x10] sm:$0xff]  ;;  %v239_v18 = vld [vmem:[#allocation5 + $0x18] sm:$0xff]  ;;  %vm275_vm14 = vcmask 457728   ;;  %s732_s15 = sshll.u32 %s1122_s6, 8 }
  0x4a   : > { %v1136_v2 = vshrl.u32 %v178_v0, 7  ;;  %243 = vxpose.xlu0.b32.start [1/7] (short) %v236_v5, 128  ;;  %v240_v19 = vld [vmem:[#allocation5 + $0x20] sm:$0xff]  ;;  %v241_v20 = vld [vmem:[#allocation5 + $0x28] sm:$0xff]  ;;  %v242_v21 = vld [vmem:[#allocation5 + $0x30] sm:$0xff]  ;;  %s1332_s17 = scalar_lea.vmem [#allocation7], %s732_s15  ;;  %s783_s8 = sshll.u32 %s1036_s13, 8 }
  0x4b   : > { %s639_s18 = sshll.u32 %s1332_s17, 4  ;;  %s1370_s20 = scalar_lea.hbm %s1441_s2, %s783_s8  ;;  %s1380_s18 = int_to_ptr.vmem [resolvable:$true] %s639_s18 }
  0x4c   : > { %v192_v3 = vsub.s32 1, %v1136_v2  ;;  %v188_v4 = vsub.s32 0, %v1136_v2  ;;  %v185_v6 = vadd.s32 48, %v1136_v2  ;;  %v184_v7 = vadd.s32 40, %v1136_v2  ;;  %s626_s23 = scalar_lea.sflag [#allocation4], %s1122_s6  ;;  %s920_s24 = scalar_lea.vmem %s1380_s18, 4096 }
  0x4d   : > { %v183_v12 = vadd.s32 32, %v1136_v2  ;;  %v182_v13 = vadd.s32 24, %v1136_v2  ;;  %v181_v16 = vadd.s32 16, %v1136_v2  ;;  %v180_v17 = vadd.s32 8, %v1136_v2  ;;  %p921_p8 = scmp.ne.s32.totalorder %s1380_s18, %s920_s24  ;;  %p1457_p3 = scmp.ne.s32.totalorder %s1451_s30, 0 }
  0x4e   : > { %v193_v10 = vrot.slane %v177_v9, %v192_v3  ;;  %v189_v11 = vrot.slane %v177_v9, %v188_v4  ;;  %244 = vxpose.xlu0.b32.cont [2/7] (short) %v237_v8, 128  ;;  %s996_s25 = smov [#allocation7]  }
  0x4f   : > { %p922_p11 = pnand %p921_p8, %p1457_p3  ;;  %s924_s26 = sshll.u32 %s996_s25, 4  ;;  %s925_s26 = int_to_ptr.vmem [resolvable:$false] %s924_s26 }
  0x50   : > { %vm207_vm0 = vcmp.eq.s32.totalorder %v185_v6, %v193_v10  ;;  %vm206_vm1 = vcmp.eq.s32.totalorder %v185_v6, %v189_v11  ;;  %vm205_vm2 = vcmp.eq.s32.totalorder %v184_v7, %v193_v10  ;;  %vm204_vm3 = vcmp.eq.s32.totalorder %v184_v7, %v189_v11  ;;  %s926_s27 = scalar_lea.vmem %s925_s26, 8192  ;;  %p927_p10 = scmp.lt.s32.totalorder %s1380_s18, %s925_s26 }
  0x51   : > { %747 = vmatprep.subr.msk.mxu0 %vm207_vm0, %v995_v15  ;;  %vm203_vm4 = vcmp.eq.s32.totalorder %v183_v12, %v193_v10  ;;  %vm202_vm5 = vcmp.eq.s32.totalorder %v183_v12, %v189_v11  ;;  %784 = vmatprep.subr.msk.mxu1 %vm207_vm0, %v995_v15  ;;  %vm201_vm6 = vcmp.eq.s32.totalorder %v182_v13, %v193_v10  ;;  %p923_p7 = pneg %p922_p11  ;;  %p928_p2 = scmp.lt.s32.totalorder %s926_s27, %s920_s24 }
  0x52   : > { %748 = vmatpush1.msk.msra.mxu0 %vm206_vm1, %v995_v15  ;;  %245 = vxpose.xlu0.b32.cont [3/7] (short) %v238_v14, 128  ;;  %vm200_vm7 = vcmp.eq.s32.totalorder %v182_v13, %v189_v11  ;;  %vm199_vm8 = vcmp.eq.s32.totalorder %v181_v16, %v193_v10  ;;  %vm198_vm9 = vcmp.eq.s32.totalorder %v181_v16, %v189_v11 }
  0x53   : > { %749 = vmatprep.subr.msk.mxu0 %vm205_vm2, %v995_v15  ;;  %791 = vmatpush1.msk.msra.mxu1 %vm206_vm1, %v995_v15  ;;  %vm197_vm10 = vcmp.eq.s32.totalorder %v180_v17, %v193_v10  ;;  %vm196_vm11 = vcmp.eq.s32.totalorder %v180_v17, %v189_v11  ;;  %vm195_vm12 = vcmp.eq.s32.totalorder %v1136_v2, %v193_v10  ;;  %p929_p13 = por %p928_p2, %p927_p10 }
  0x54   : > { %750 = vmatpush1.msk.msra.mxu0 %vm204_vm3, %v995_v15  ;;  %785 = vmatprep.subr.msk.mxu1 %vm205_vm2, %v995_v15  ;;  %vm194_vm13 = vcmp.eq.s32.totalorder %v1136_v2, %v189_v11 }
  0x55   : > { %751 = vmatprep.subr.msk.mxu0 %vm203_vm4, %v995_v15  ;;  %792 = vmatpush1.msk.msra.mxu1 %vm204_vm3, %v995_v15  ;;  %p930_p0 = pnand %p929_p13, %p923_p7 }
  0x56   : > { %752 = vmatpush1.msk.msra.mxu0 %vm202_vm5, %v995_v15  ;;  %246 = vxpose.xlu0.b32.cont [4/7] (short) %v239_v18, 128 }
  0x57   : > { %753 = vmatprep.subr.msk.mxu0 %vm201_vm6, %v995_v15  ;;  %786 = vmatprep.subr.msk.mxu1 %vm203_vm4, %v995_v15 }
  0x58   : > { %754 = vmatpush1.msk.msra.mxu0 %vm200_vm7, %v995_v15  ;;  %793 = vmatpush1.msk.msra.mxu1 %vm202_vm5, %v995_v15 }
  0x59   : > { %755 = vmatprep.subr.msk.mxu0 %vm199_vm8, %v995_v15  ;;  %787 = vmatprep.subr.msk.mxu1 %vm201_vm6, %v995_v15 }
  0x5a   : > { %756 = vmatpush1.msk.msra.mxu0 %vm198_vm9, %v995_v15  ;;  %247 = vxpose.xlu0.b32.cont [5/7] (short) %v240_v19, 128 }
  0x5b   : > { %757 = vmatprep.subr.msk.mxu0 %vm197_vm10, %v995_v15  ;;  %794 = vmatpush1.msk.msra.mxu1 %vm200_vm7, %v995_v15 }
  0x5c   : > { %758 = vmatpush1.msk.msra.mxu0 %vm196_vm11, %v995_v15  ;;  %788 = vmatprep.subr.msk.mxu1 %vm199_vm8, %v995_v15 }
  0x5d   : > { %759 = vmatprep.subr.msk.mxu0 %vm195_vm12, %v995_v15  ;;  %795 = vmatpush1.msk.msra.mxu1 %vm198_vm9, %v995_v15 }
  0x5e   : > { %760 = vmatpush1.msk.msra.mxu0 %vm194_vm13, %v995_v15  ;;  %248 = vxpose.xlu0.b32.cont [6/7] (short) %v241_v20, 128 }
  0x5f   : > { %789 = vmatprep.subr.msk.mxu1 %vm197_vm10, %v995_v15 }
  0x60   : > { %796 = vmatpush1.msk.msra.mxu1 %vm196_vm11, %v995_v15 }
  0x61   : > { %790 = vmatprep.subr.msk.mxu1 %vm195_vm12, %v995_v15 }
  0x62   : > { %797 = vmatpush1.msk.msra.mxu1 %vm194_vm13, %v995_v15  ;;  %249 = vxpose.xlu0.b32.end [7/7] (short) %v242_v21, 128 }
  0xc6   : > { %v259_v22 = vpop.trf.xlu0 }
  0xc7   : > { %761 = vmatmul.mubr.msk.f32.vlgmr.msra.gmra.mxu0 %vm275_vm14, %v259_v22 }
  0xc8   : > { %394 = vmatprep.mubr.f32.mxu0 %v994_v1 }
  0xca   : > { %v260_v23 = vpop.trf.xlu0 }
  0xcb   : > { %762 = vmatmul.mubr.msk.f32.gmra.mxu0 %vm275_vm14, %v260_v23 }
  0xcc   : > { %400 = vmatprep.mubr.f32.mxu0 %v994_v1 }
  0xce   : > { %v261_v24 = vpop.trf.xlu0 }
  0xcf   : > { %763 = vmatmul.mubr.msk.f32.gmra.mxu0 %vm275_vm14, %v261_v24 }
  0xd0   : > { %406 = vmatprep.mubr.f32.mxu0 %v994_v1 }
  0xd2   : > { %v262_v25 = vpop.trf.xlu0 }
  0xd3   : > { %764 = vmatmul.mubr.msk.f32.gmra.mxu0 %vm275_vm14, %v262_v25 }
  0xd4   : > { %412 = vmatprep.mubr.f32.mxu0 %v994_v1 }
  0xd6   : > { %v263_v26 = vpop.trf.xlu0 }
  0xd7   : > { %765 = vmatmul.mubr.msk.f32.gmra.mxu0 %vm275_vm14, %v263_v26 }
  0xd8   : > { %418 = vmatprep.mubr.f32.mxu0 %v994_v1 }
  0xda   : > { %v264_v27 = vpop.trf.xlu0 }
  0xdb   : > { %766 = vmatmul.mubr.msk.f32.gmra.mxu0 %vm275_vm14, %v264_v27 }
  0xdc   : > { %424 = vmatprep.mubr.f32.mxu0 %v994_v1 }
  0xde   : > { %v265_v28 = vpop.trf.xlu0 }
  0xdf   : > { %767 = vmatmul.mubr.msk.f32.gmra.mxu0 %vm275_vm14, %v265_v28 }
  0xe0   : > { %430 = vmatprep.mubr.f32.mxu0 %v994_v1 }
  0xe2   : > { %v266_v29 = vpop.trf.xlu0 }
  0xe3   : > { %768 = vmatmul.mubr.msk.f32.gmra.mxu0 %vm275_vm14, %v266_v29 }
  0xe6   : > { %v267_v30 = vpop.trf.xlu0 }
  0xe7   : > { %769 = vmatmul.mubr.msk.f32.vlgmr.msra.gmra.mxu1 %vm275_vm14, %v267_v30 }
  0xe8   : > { %442 = vmatprep.mubr.f32.mxu1 %v994_v1 }
  0xea   : > { %v268_v31 = vpop.trf.xlu0 }
  0xeb   : > { %770 = vmatmul.mubr.msk.f32.gmra.mxu1 %vm275_vm14, %v268_v31 }
  0xec   : > { %448 = vmatprep.mubr.f32.mxu1 %v994_v1 }
  0xee   : > { %v269_v32 = vpop.trf.xlu0 }
  0xef   : > { %771 = vmatmul.mubr.msk.f32.gmra.mxu1 %vm275_vm14, %v269_v32 }
  0xf0   : > { %454 = vmatprep.mubr.f32.mxu1 %v994_v1 }
  0xf2   : > { %v270_v33 = vpop.trf.xlu0 }
  0xf3   : > { %772 = vmatmul.mubr.msk.f32.gmra.mxu1 %vm275_vm14, %v270_v33 }
  0xf4   : > { %460 = vmatprep.mubr.f32.mxu1 %v994_v1 }
  0xf6   : > { %v271_v34 = vpop.trf.xlu0 }
  0xf7   : > { %773 = vmatmul.mubr.msk.f32.gmra.mxu1 %vm275_vm14, %v271_v34 }
  0xf8   : > { %466 = vmatprep.mubr.f32.mxu1 %v994_v1 }
  0xfa   : > { %v272_v35 = vpop.trf.xlu0 }
  0xfb   : > { %774 = vmatmul.mubr.msk.f32.gmra.mxu1 %vm275_vm14, %v272_v35 }
  0xfc   : > { %472 = vmatprep.mubr.f32.mxu1 %v994_v1 }
  0xfe   : > { %v273_v36 = vpop.trf.xlu0 }
  0xff   : > { %775 = vmatmul.mubr.msk.f32.gmra.mxu1 %vm275_vm14, %v273_v36 }
 0x100   : > { %478 = vmatprep.mubr.f32.mxu1 %v994_v1 }
 0x102   : > { %v274_v37 = vpop.trf.xlu0 }
 0x103   : > { %776 = vmatmul.mubr.msk.f32.gmra.mxu1 %vm275_vm14, %v274_v37 }
 0x187   : > { %v1204_v38 = vpop.f32.mrf.mxu0 }
 0x188   : > { %v485_v53 = vmul.f32 %v1204_v38, %v1204_v38 }
 0x189   : > { %v1206_v39 = vpop.f32.mrf.mxu0 }
 0x18a   : > { %v486_v58 = vmul.f32 %v1206_v39, %v1206_v39 }
 0x18b   : > { %v1208_v40 = vpop.f32.mrf.mxu0 }
 0x18c   : > { %v487_v51 = vmul.f32 %v1208_v40, %v1208_v40 }
 0x18d   : > { %v1210_v41 = vpop.f32.mrf.mxu0 }
 0x18e   : > { %v488_v54 = vmul.f32 %v1210_v41, %v1210_v41  ;;  %v517_v59 = vadd.f32 %v487_v51, %v485_v53 }
 0x18f   : > { %v1212_v42 = vpop.f32.mrf.mxu0 }
 0x190   : > { %v489_v55 = vmul.f32 %v1212_v42, %v1212_v42  ;;  %v538_v63 = vadd.f32 %v488_v54, %v486_v58 }
 0x191   : > { %v1214_v43 = vpop.f32.mrf.mxu0 }
 0x192   : > { %v490_v60 = vmul.f32 %v1214_v43, %v1214_v43  ;;  %v518_v0 = vadd.f32 %v517_v59, %v489_v55 }
 0x193   : > { %v1216_v44 = vpop.f32.mrf.mxu0 }
 0x194   : > { %v491_v61 = vmul.f32 %v1216_v44, %v1216_v44  ;;  %v539_v5 = vadd.f32 %v538_v63, %v490_v60 }
 0x195   : > { %v1218_v45 = vpop.f32.mrf.mxu0 }
 0x196   : > { %v492_v1 = vmul.f32 %v1218_v45, %v1218_v45  ;;  %v519_v6 = vadd.f32 %v518_v0, %v491_v61 }
 0x197   : > { %v1220_v46 = vpop.f32.mrf.mxu0 }
 0x198   : > { %v493_v2 = vmul.f32 %v1220_v46, %v1220_v46  ;;  %v540_v10 = vadd.f32 %v539_v5, %v492_v1 }
 0x199   : > { %v1222_v47 = vpop.f32.mrf.mxu0 }
 0x19a   : > { %v494_v7 = vmul.f32 %v1222_v47, %v1222_v47  ;;  %v520_v11 = vadd.f32 %v519_v6, %v493_v2 }
 0x19b   : > { %v1224_v48 = vpop.f32.mrf.mxu0 }
 0x19c   : > { %v495_v8 = vmul.f32 %v1224_v48, %v1224_v48  ;;  %v541_v16 = vadd.f32 %v540_v10, %v494_v7 }
 0x19d   : > { %v1226_v49 = vpop.f32.mrf.mxu0 }
 0x19e   : > { %v496_v12 = vmul.f32 %v1226_v49, %v1226_v49  ;;  %v521_v17 = vadd.f32 %v520_v11, %v495_v8 }
 0x19f   : > { %v1228_v50 = vpop.f32.mrf.mxu0 }
 0x1a0   : > { %v497_v13 = vmul.f32 %v1228_v50, %v1228_v50  ;;  %v542_v21 = vadd.f32 %v541_v16, %v496_v12 }
 0x1a1   : > { %v1240_v56 = vpop.f32.mrf.mxu0 }
 0x1a2   : > { %v498_v18 = vmul.f32 %v1240_v56, %v1240_v56  ;;  %v522_v22 = vadd.f32 %v521_v17, %v497_v13 }
 0x1a3   : > { %v1256_v3 = vpop.f32.mrf.mxu0 }
 0x1a4   : > { %v499_v19 = vmul.f32 %v1256_v3, %v1256_v3  ;;  %v543_v26 = vadd.f32 %v542_v21, %v498_v18 }
 0x1a5   : > { %v1270_v14 = vpop.f32.mrf.mxu0 }
 0x1a6   : > { %v500_v23 = vmul.f32 %v1270_v14, %v1270_v14  ;;  %v523_v27 = vadd.f32 %v522_v22, %v499_v19 }
 0x1a7   : > { %v1232_v52 = vpop.f32.mrf.mxu1 }
 0x1a8   : > { %v501_v24 = vmul.f32 %v1232_v52, %v1232_v52  ;;  %v544_v31 = vadd.f32 %v543_v26, %v500_v23 }
 0x1a9   : > { %v1242_v57 = vpop.f32.mrf.mxu1 }
 0x1aa   : > { %v502_v28 = vmul.f32 %v1242_v57, %v1242_v57  ;;  %v524_v32 = vadd.f32 %v523_v27, %v501_v24 }
 0x1ab   : > { %v1250_v62 = vpop.f32.mrf.mxu1 }
 0x1ac   : > { %v503_v29 = vmul.f32 %v1250_v62, %v1250_v62  ;;  %v545_v36 = vadd.f32 %v544_v31, %v502_v28 }
 0x1ad   : > { %v1258_v4 = vpop.f32.mrf.mxu1 }
 0x1ae   : > { %v504_v33 = vmul.f32 %v1258_v4, %v1258_v4  ;;  %v525_v37 = vadd.f32 %v524_v32, %v503_v29 }
 0x1af   : > { %v1264_v9 = vpop.f32.mrf.mxu1 }
 0x1b0   : > { %v505_v34 = vmul.f32 %v1264_v9, %v1264_v9  ;;  %v546_v55 = vadd.f32 %v545_v36, %v504_v33 }
 0x1b1   : > { %v1272_v15 = vpop.f32.mrf.mxu1 }
 0x1b2   : > { %v506_v51 = vmul.f32 %v1272_v15, %v1272_v15  ;;  %v526_v58 = vadd.f32 %v525_v37, %v505_v34 }
 0x1b3   : > { %v1278_v20 = vpop.f32.mrf.mxu1 }
 0x1b4   : > { %v507_v53 = vmul.f32 %v1278_v20, %v1278_v20  ;;  %v547_v63 = vadd.f32 %v546_v55, %v506_v51 }
 0x1b5   : > { %v1284_v25 = vpop.f32.mrf.mxu1 }
 0x1b6   : > { %v508_v59 = vmul.f32 %v1284_v25, %v1284_v25  ;;  %v527_v0 = vadd.f32 %v526_v58, %v507_v53 }
 0x1b7   : > { %v1290_v30 = vpop.f32.mrf.mxu1 }
 0x1b8   : > { %v509_v60 = vmul.f32 %v1290_v30, %v1290_v30  ;;  %v548_v6 = vadd.f32 %v547_v63, %v508_v59 }
 0x1b9   : > { %v1296_v35 = vpop.f32.mrf.mxu1 }
 0x1ba   : > { %v510_v1 = vmul.f32 %v1296_v35, %v1296_v35  ;;  %v528_v7 = vadd.f32 %v527_v0, %v509_v60 }
 0x1bb   : > { %v1302_v54 = vpop.f32.mrf.mxu1 }
 0x1bc   : > { %v511_v2 = vmul.f32 %v1302_v54, %v1302_v54  ;;  %v549_v12 = vadd.f32 %v548_v6, %v510_v1 }
 0x1bd   : > { %v1308_v61 = vpop.f32.mrf.mxu1 }
 0x1be   : > { %v512_v8 = vmul.f32 %v1308_v61, %v1308_v61  ;;  %v529_v13 = vadd.f32 %v528_v7, %v511_v2 }
 0x1bf   : > { %v1314_v5 = vpop.f32.mrf.mxu1 }
 0x1c0   : > { %v513_v10 = vmul.f32 %v1314_v5, %v1314_v5  ;;  %v550_v18 = vadd.f32 %v549_v12, %v512_v8 }
 0x1c1   : > { %v1320_v11 = vpop.f32.mrf.mxu1 }
 0x1c2   : > { %v514_v16 = vmul.f32 %v1320_v11, %v1320_v11  ;;  %v530_v19 = vadd.f32 %v529_v13, %v513_v10 }
 0x1c3   : > { %v480_v17 = vpop.f32.mrf.mxu1 }
 0x1c4   : > { %v515_v21 = vmul.f32 %v480_v17, %v480_v17  ;;  %v551_v23 = vadd.f32 %v550_v18, %v514_v16 }
 0x1c5   : > { %v482_v22 = vpop.f32.mrf.mxu1 }
 0x1c6   : > { %v531_v24 = vadd.f32 %v530_v19, %v515_v21  ;;  %v516_v26 = vmul.f32 %v482_v22, %v482_v22 }
 0x1c8   : > { %v532_v27 = vrot.slane %v531_v24, 4  ;;  %v552_v28 = vadd.f32 %v551_v23, %v516_v26 }
 0x1ca   : > { %v533_v29 = vadd.f32 %v532_v27, %v531_v24  ;;  %v553_v31 = vrot.slane %v552_v28, 4 }
 0x1cc   : > { %v534_v32 = vrot.slane %v533_v29, 2  ;;  %v554_v33 = vadd.f32 %v553_v31, %v552_v28 }
 0x1ce   : > { %v535_v34 = vadd.f32 %v534_v32, %v533_v29  ;;  %v555_v36 = vrot.slane %v554_v33, 2 }
 0x1d0   : > { %v536_v37 = vrot.slane %v535_v34, 1  ;;  %v556_v51 = vadd.f32 %v555_v36, %v554_v33 }
 0x1d2   : > { %v537_v53 = vadd.f32 %v536_v37, %v535_v34  ;;  %v557_v55 = vrot.slane %v556_v51, 1 }
 0x1d4   : > { %862 = vrsqrt.f32 %v537_v53  ;;  %v558_v58 = vadd.f32 %v557_v55, %v556_v51 }
 0x1d6   : > { %864 = vrsqrt.f32 %v558_v58 }
 0x1e1   : > { %v863_v59 = vpop.eup %862 }
 0x1e2   : > { %v591_v60 = vmul.f32 %v863_v59, %v480_v17  ;;  %v561_v63 = vmul.f32 %v863_v59, %v1204_v38  ;;  %v563_v0 = vmul.f32 %v863_v59, %v1208_v40  ;;  %v565_v1 = vmul.f32 %v863_v59, %v1212_v42 }
 0x1e3   : > { %v865_v2 = vpop.eup %864  ;;  %v567_v6 = vmul.f32 %v863_v59, %v1216_v44  ;;  %v569_v7 = vmul.f32 %v863_v59, %v1220_v46  ;;  %v571_v8 = vmul.f32 %v863_v59, %v1224_v48  ;;  %v573_v10 = vmul.f32 %v863_v59, %v1228_v50 }
 0x1e4   : > { %623 = vst [vmem:[%s1332_s17 + $0xf0] sm:$0xff] %v591_v60  ;;  %v592_v38 = vmul.f32 %v865_v2, %v482_v22  ;;  %v562_v40 = vmul.f32 %v865_v2, %v1206_v39  ;;  %v564_v42 = vmul.f32 %v865_v2, %v1210_v41  ;;  %v566_v44 = vmul.f32 %v865_v2, %v1214_v43 }
 0x1e5   : > { %593 = vst [vmem:[%s1332_s17] sm:$0xff] %v561_v63  ;;  %595 = vst [vmem:[%s1332_s17 + $0x10] sm:$0xff] %v563_v0  ;;  %v568_v46 = vmul.f32 %v865_v2, %v1218_v45  ;;  %v570_v48 = vmul.f32 %v865_v2, %v1222_v47  ;;  %v572_v50 = vmul.f32 %v865_v2, %v1226_v49 }
 0x1e6   : > { %597 = vst [vmem:[%s1332_s17 + $0x20] sm:$0xff] %v565_v1  ;;  %v574_v39 = vmul.f32 %v865_v2, %v1240_v56  ;;  %599 = vst [vmem:[%s1332_s17 + $0x30] sm:$0xff] %v567_v6  ;;  %v575_v41 = vmul.f32 %v863_v59, %v1256_v3  ;;  %v576_v43 = vmul.f32 %v865_v2, %v1270_v14 }
 0x1e7   : > { %601 = vst [vmem:[%s1332_s17 + $0x40] sm:$0xff] %v569_v7  ;;  %603 = vst [vmem:[%s1332_s17 + $0x50] sm:$0xff] %v571_v8  ;;  %v577_v45 = vmul.f32 %v863_v59, %v1232_v52  ;;  %v578_v47 = vmul.f32 %v865_v2, %v1242_v57  ;;  %v579_v49 = vmul.f32 %v863_v59, %v1250_v62 }
 0x1e8   : > { %605 = vst [vmem:[%s1332_s17 + $0x60] sm:$0xff] %v573_v10  ;;  %624 = vst [vmem:[%s1332_s17 + $0xf8] sm:$0xff] %v592_v38  ;;  %v580_v56 = vmul.f32 %v865_v2, %v1258_v4  ;;  %v581_v12 = vmul.f32 %v863_v59, %v1264_v9  ;;  %v582_v3 = vmul.f32 %v865_v2, %v1272_v15 }
 0x1e9   : > { %594 = vst [vmem:[%s1332_s17 + $0x8] sm:$0xff] %v562_v40  ;;  %596 = vst [vmem:[%s1332_s17 + $0x18] sm:$0xff] %v564_v42  ;;  %v583_v52 = vmul.f32 %v863_v59, %v1278_v20  ;;  %v584_v57 = vmul.f32 %v865_v2, %v1284_v25  ;;  %v585_v62 = vmul.f32 %v863_v59, %v1290_v30 }
 0x1ea   : > { %598 = vst [vmem:[%s1332_s17 + $0x28] sm:$0xff] %v566_v44  ;;  %600 = vst [vmem:[%s1332_s17 + $0x38] sm:$0xff] %v568_v46  ;;  %v586_v4 = vmul.f32 %v865_v2, %v1296_v35  ;;  %v587_v9 = vmul.f32 %v863_v59, %v1302_v54  ;;  %v588_v14 = vmul.f32 %v865_v2, %v1308_v61 }
 0x1eb   : > { %602 = vst [vmem:[%s1332_s17 + $0x48] sm:$0xff] %v570_v48  ;;  %604 = vst [vmem:[%s1332_s17 + $0x58] sm:$0xff] %v572_v50  ;;  %v589_v15 = vmul.f32 %v863_v59, %v1314_v5  ;;  %v590_v20 = vmul.f32 %v865_v2, %v1320_v11 }
 0x1ec   : > { %606 = vst [vmem:[%s1332_s17 + $0x68] sm:$0xff] %v574_v39  ;;  %607 = vst [vmem:[%s1332_s17 + $0x70] sm:$0xff] %v575_v41 }
 0x1ed   : > { %608 = vst [vmem:[%s1332_s17 + $0x78] sm:$0xff] %v576_v43  ;;  %609 = vst [vmem:[%s1332_s17 + $0x80] sm:$0xff] %v577_v45 }
 0x1ee   : > { %610 = vst [vmem:[%s1332_s17 + $0x88] sm:$0xff] %v578_v47  ;;  %611 = vst [vmem:[%s1332_s17 + $0x90] sm:$0xff] %v579_v49 }
 0x1ef   : > { %612 = vst [vmem:[%s1332_s17 + $0x98] sm:$0xff] %v580_v56  ;;  %613 = vst [vmem:[%s1332_s17 + $0xa0] sm:$0xff] %v581_v12 }
 0x1f0   : > { %614 = vst [vmem:[%s1332_s17 + $0xa8] sm:$0xff] %v582_v3  ;;  %615 = vst [vmem:[%s1332_s17 + $0xb0] sm:$0xff] %v583_v52 }
 0x1f1   : > { %616 = vst [vmem:[%s1332_s17 + $0xb8] sm:$0xff] %v584_v57  ;;  %617 = vst [vmem:[%s1332_s17 + $0xc0] sm:$0xff] %v585_v62 }
 0x1f2   : > { %618 = vst [vmem:[%s1332_s17 + $0xc8] sm:$0xff] %v586_v4  ;;  %619 = vst [vmem:[%s1332_s17 + $0xd0] sm:$0xff] %v587_v9 }
 0x1f3   : > { %620 = vst [vmem:[%s1332_s17 + $0xd8] sm:$0xff] %v588_v14  ;;  %621 = vst [vmem:[%s1332_s17 + $0xe0] sm:$0xff] %v589_v15 }
 0x1f4   : > { %622 = vst [vmem:[%s1332_s17 + $0xe8] sm:$0xff] %v590_v20 }
 0x1f5   : > { %933 = shalt.err (!%p930_p0)
}
 0x1f6   : > { %s934_s28 = scalar_lea.hbm %s1370_s20, 4096  ;;  %s938_s5 = scalar_lea.hbm %s1441_s2, 8192 }
 0x1f7   : > { %p935_p5 = scmp.ne.s32.totalorder %s1370_s20, %s934_s28  ;;  %p939_p1 = scmp.lt.s32.totalorder %s1370_s20, %s1441_s2 }
 0x1f8   : > { %p940_p4 = scmp.lt.s32.totalorder %s938_s5, %s934_s28 }
 0x1f9   : > { %p936_p9 = pnand %p935_p5, %p1457_p3 }
 0x1fa   : > { %p941_p6 = por %p940_p4, %p939_p1 }
 0x1fb   : > { %p937_p12 = pneg %p936_p9 }
 0x1fd   : > { %p942_p8 = pnand %p941_p6, %p937_p12 }
 0x1ff   : > { %945 = shalt.err (!%p942_p8)
}
 0x200   : > { %s997_s22 = smov 256   ;;  %s998_s15 = smov 512  }
 0x201   : > { %s999_s17 = smov 16  }
 0x202   : > { %804 = dma.vmem_to_hbm [thread:$0]  (%p1457_p3), %s1380_s18, 4096, %s1370_s20, %s626_s23, %s997_s22, %s998_s15, %s999_s17  }
 0x203 PF: > { %s654_s8 = sand.u32 1, %s976_s9   ;;  %p1458_p11 = scmp.ne.s32.totalorder %s1447_s16, 0 }
 0x204   : > { %p1459_p7 = scmp.ge.s32.totalorder %s988_s12, 2  ;;  %s655_s13 = scalar_lea.sflag [#allocation4], %s654_s8 }
 0x206   : > { %p815_p10 = pnand %p1459_p7, %p1458_p11 }
 0x208   : > { %p816_p2 = pneg %p815_p10 }
 0x20a   : > { %971 = dma.done.wait (%p816_p2), %s655_s13, 4096  }
 0x20b   : > { %973 = vsyncadd (%p816_p2), %s655_s13, 4294963200  ;;  %p16_p13 = scmp.ge.s32.totalorder %s1069_s21, 4   ;;  %s1460_s9 = smov %s980_s10 }
 0x20c   : > { %s1461_s10 = smov %s984_s11  ;;  %s1462_s11 = smov %s1086_s29 }
 0x20d   : > { %s1463_s12 = smov %s1069_s21  ;;  %18 = sbr.rel (!%p16_p13) target bundleno = 6 (0x6), region = 77 }
 0x212   :  { %660 = vsyncpa [#allocation3], 1 }
 0x213   :  { %662 = vsyncpa [#allocation3 + $0x1], 1 }
 0x214   :  { %663 = vsyncpa [#allocation6], 1 }
 0x215   :  { %664 = vsyncpa [#allocation4], 1 }
 0x216   :  { %666 = vsyncpa [#allocation4 + $0x1], 1 }

</bundles_post_ra>
